<compile_context>
chip_gen: v7x
topology: tpu7x:2x2x1
jax: 0.10.0
libtpu: 0.0.40
codegen_flags: <defaults>
</compile_context>

<pallas_src>
import math
import numpy as np
import jax
import jax.numpy as jnp
from jax.experimental import pallas as pl
from jax.experimental.pallas import tpu as pltpu

HIDDEN = 32                      # embedding_dim
N_LAYERS = 2                     # encoder_layers
KP = 16                          # per-token code width: node4+nb, edge4+eb, ord1, ord2, sep, cls, pad2
TOK_PER_ROW = 8                  # 8 tokens packed per 256-lane output row (128-lane input row)
ROW_IN = TOK_PER_ROW * KP        # 128  (bf16 -> lane-dense loads)
ROW_OUT = TOK_PER_ROW * HIDDEN   # 256  (bf16 -> lane-dense stores, fills 256-wide MXU)
MAX_ROW_BLOCK = 2048             # rows (= 16384 tokens) per grid step, ~3 MiB double-buffered bf16
MIN_MEGACORE_ROWS = 256          # once there is this much work, keep >=2 blocks for v7x's 2 TCs
ROW_ALIGN = 16                   # bf16 sublane quantum


def _round_up(x, m):
    return (x + m - 1) // m * m


def _pick_row_block(rt):
    rb = min(MAX_ROW_BLOCK, rt)
    if rt >= 2 * MIN_MEGACORE_ROWS:
        # keep at least 2 row-blocks so the "parallel" grid axis can shard
        # across both v7x TensorCores.
        rb = min(rb, _round_up(-(-rt // 2), ROW_ALIGN))
    return max(ROW_ALIGN, _round_up(rb, ROW_ALIGN))


# ----------------------------- Pallas kernel -----------------------------

def _fused_embed_kernel(x_ref, w_ref, o_ref):
    # x: [RB, 128] bf16  packed per-token code vectors (8 tokens / row)
    # w: [128, 256] bf16 block-diagonal (8 copies of the combined 16x32 weight)
    # o: [RB, 256] bf16  packed output features (8 tokens / row), lane-dense
    o_ref[...] = jnp.dot(x_ref[...], w_ref[...],
                         preferred_element_type=jnp.float32
                         ).astype(o_ref.dtype)


def fused_embed(x_rows, w_blk):
    """x_rows: [RT, 128] bf16, w_blk: [128, 256] bf16 -> [RT, 256] bf16."""
    rt = x_rows.shape[0]                      # multiple of ROW_ALIGN (host-padded)
    rb = _pick_row_block(rt)
    grid = (pl.cdiv(rt, rb),)                 # ragged last block OK: OOB stores dropped,
                                              # garbage rows are independent and sliced off.
    bytes_accessed = 2 * (rt * ROW_IN + ROW_IN * ROW_OUT + rt * ROW_OUT)
    useful_flops = rt * TOK_PER_ROW * 2 * KP * HIDDEN
    return pl.pallas_call(
        _fused_embed_kernel,
        out_shape=jax.ShapeDtypeStruct((rt, ROW_OUT), jnp.bfloat16),
        grid=grid,
        in_specs=[
            pl.BlockSpec((rb, ROW_IN), lambda i: (i, 0)),
            pl.BlockSpec((ROW_IN, ROW_OUT), lambda i: (0, 0)),
        ],
        out_specs=pl.BlockSpec((rb, ROW_OUT), lambda i: (i, 0)),
        compiler_params=pltpu.CompilerParams(
            dimension_semantics=("parallel",),
            vmem_limit_bytes=32 * 1024 * 1024),
        cost_estimate=pl.CostEstimate(
            flops=useful_flops,
            transcendentals=0,
            bytes_accessed=bytes_accessed),
    )(x_rows, w_blk)


# ----------------------------- weight packing (host, once) -----------------------------

def build_weights(params):
    """Combined [16, 32] weight, replicated block-diagonally to [128, 256] bf16."""
    d = HIDDEN
    wc = np.zeros((KP, d), np.float32)
    wc[0:4] = np.asarray(params['node_w'], np.float32)
    wc[4] = np.asarray(params['node_b'], np.float32)
    wc[5:9] = np.asarray(params['edge_w'], np.float32)
    wc[9] = np.asarray(params['edge_b'], np.float32)
    ow = np.asarray(params['order_w'], np.float32)
    wc[10] = ow[1]                                   # order 1 (edge, src != dst)
    wc[11] = ow[2]                                   # order 2 (node / self-loop)
    wc[12] = np.asarray(params['sep_w'], np.float32)[0]    # SEP token
    wc[13] = np.asarray(params['graph_w'], np.float32)[0]  # CLS token
    w_blk = np.zeros((ROW_IN, ROW_OUT), np.float32)
    for j in range(TOK_PER_ROW):
        w_blk[j * KP:(j + 1) * KP, j * d:(j + 1) * d] = wc
    return jnp.asarray(w_blk, jnp.bfloat16)


# ----------------------------- glue (get_batch, pure numpy on host) -----------------------------

def build_operands(node_data, edge_index, edge_data, node_num, edge_num):
    """Mirror PretrainEmbedding.get_batch bookkeeping; emit the packed kernel operand.

    All ragged bookkeeping, the per-token code scatter, the 8-token row packing
    and the alignment padding happen here in numpy (host-resident), so the
    device sees exactly one bf16 operand and one pallas_call.
    """
    ctr_nd = np.asarray(node_data[0], np.float32)
    ncp_nd = np.asarray(node_data[1], np.float32)
    ctr_ei = np.asarray(edge_index[0])
    ncp_ei = np.asarray(edge_index[1])
    ctr_ed = np.asarray(edge_data[0], np.float32)
    ncp_ed = np.asarray(edge_data[1], np.float32)
    ctr_n, ncp_n = [list(map(int, v)) for v in node_num]
    ctr_e, ncp_e = [list(map(int, v)) for v in edge_num]
    b = len(ctr_n)

    seq_len = [ctr_n[i] + ncp_n[i] + ctr_e[i] + ncp_e[i] for i in range(b)]
    max_len = max(seq_len) + 2                 # + two SEP slots
    t_out = max_len + 1                        # + CLS
    r = -(-t_out // TOK_PER_ROW)               # packed rows per graph
    t8 = r * TOK_PER_ROW

    padded_index = np.zeros((b, max_len, 2), dtype=np.int32)
    padding_mask = np.zeros((b, max_len), dtype=bool)

    # per-token 16-dim code vectors; token 0 of each graph is the CLS token
    code = np.zeros((b, t8, KP), dtype=np.float32)
    code[:, 0, 13] = 1.0                       # CLS flag

    off_cn = off_ce = off_nn = off_ne = 0
    for i in range(b):
        pos = 0
        for j in range(ctr_n[i]):                             # center nodes
            padded_index[i, pos] = (j, j)
            tok = pos + 1
            code[i, tok, 0:4] = ctr_nd[off_cn + j]
            code[i, tok, 4] = 1.0                             # node bias
            code[i, tok, 11] = 1.0                            # (j, j) -> order 2
            pos += 1
        for j in range(ctr_e[i]):                             # center edges
            s, t = int(ctr_ei[0, off_ce + j]), int(ctr_ei[1, off_ce + j])
            padded_index[i, pos] = (s, t)
            tok = pos + 1
            code[i, tok, 5:9] = ctr_ed[off_ce + j]
            code[i, tok, 9] = 1.0                             # edge bias
            code[i, tok, 11 if s == t else 10] = 1.0          # order 2 / 1
            pos += 1
        if pos < seq_len[i]:                                  # SEP #1 (kept unless masked)
            code[i, pos + 1, 12] = 1.0
        pos += 1
        for j in range(ncp_n[i]):                             # ncp nodes
            padded_index[i, pos] = (j, j)
            if pos < seq_len[i]:
                tok = pos + 1
                code[i, tok, 0:4] = ncp_nd[off_nn + j]
                code[i, tok, 4] = 1.0
                code[i, tok, 11] = 1.0
            pos += 1
        for j in range(ncp_e[i]):                             # ncp edges (last hits seq_len -> masked)
            s, t = int(ncp_ei[0, off_ne + j]), int(ncp_ei[1, off_ne + j])
            padded_index[i, pos] = (s, t)
            if pos < seq_len[i]:
                tok = pos + 1
                code[i, tok, 5:9] = ncp_ed[off_ne + j]
                code[i, tok, 9] = 1.0
                code[i, tok, 11 if s == t else 10] = 1.0
            pos += 1
        # SEP #2 sits at seq_len + 1 -> always erased by the final masked_fill,
        # so no code flag is emitted (matches the PyTorch module output).
        padding_mask[i, :] = np.arange(max_len) >= seq_len[i]
        off_cn += ctr_n[i]; off_ce += ctr_e[i]; off_nn += ncp_n[i]; off_ne += ncp_e[i]

    rt = b * r
    rt_pad = _round_up(max(rt, ROW_ALIGN), ROW_ALIGN)         # host-side pad only
    x_rows = np.zeros((rt_pad, ROW_IN), dtype=np.float32)
    x_rows[:rt] = code.reshape(rt, ROW_IN)
    return x_rows, padded_index, padding_mask, (b, r, t_out, max_len)


# ----------------------------- forward -----------------------------

def pretrain_embedding_forward(batched_data, params):
    """Forward of PretrainEmbedding (type_id=True, optional id branches off)."""
    # TODO(synk): rand_node_id / orf_node_id / etype_id / func_id / token_id
    # branches and perturb are disabled by the assumed config and not implemented.
    x_rows_np, padded_index, padding_mask, (b, r, t_out, _) = build_operands(
        batched_data['node_data'], batched_data['edge_index'],
        batched_data['edge_data'], batched_data['node_num'],
        batched_data['edge_num'])
    w_blk = build_weights(params)                               # [128, 256] bf16
    x_rows = jnp.asarray(x_rows_np, jnp.bfloat16)               # [rt_pad, 128] bf16
    out_rows = fused_embed(x_rows, w_blk)                       # [rt_pad, 256] bf16 (packed)
    # Packed -> (B, T, D) unpack.  This minor-dim 256->32 relayout is the one
    # remaining extra HBM pass; a production consumer should take `out_rows`
    # (packed, lane-dense) directly and unpack inside its own kernel.
    feat = out_rows[:b * r].reshape(b, r * TOK_PER_ROW, HIDDEN)[:, :t_out, :]
    pad_mask = np.concatenate(
        [np.zeros((b, 1), dtype=bool), padding_mask], axis=1)
    return feat, jnp.asarray(pad_mask), jnp.asarray(padded_index)


# ----------------------------- plain reference (PyTorch semantics) -----------------------------

def reference_forward(batched_data, params):
    ctr_nd, ncp_nd = batched_data['node_data']
    ctr_n, ncp_n = batched_data['node_num']
    ctr_ei, ncp_ei = batched_data['edge_index']
    ctr_ed, ncp_ed = batched_data['edge_data']
    ctr_e, ncp_e = batched_data['edge_num']

    nw = np.asarray(params['node_w']); nb_ = np.asarray(params['node_b'])
    ew = np.asarray(params['edge_w']); eb = np.asarray(params['edge_b'])
    ow = np.asarray(params['order_w']); sw = np.asarray(params['sep_w'])
    gw = np.asarray(params['graph_w'])

    cnf = np.asarray(ctr_nd) @ nw + nb_
    nnf = np.asarray(ncp_nd) @ nw + nb_
    cef = np.asarray(ctr_ed) @ ew + eb
    nef = np.asarray(ncp_ed) @ ew + eb

    b = len(ctr_n)
    seq_len = [ctr_n[i] + ncp_n[i] + ctr_e[i] + ncp_e[i] for i in range(b)]
    max_len = max(seq_len) + 2
    pf = np.zeros((b, max_len, HIDDEN), np.float32)
    pidx = np.zeros((b, max_len, 2), np.int32)
    pmask = np.zeros((b, max_len), bool)
    sep_pos = np.zeros((b, 2), np.int64)
    off_cn = off_ce = off_nn = off_ne = 0
    for i in range(b):
        pos = 0
        for j in range(ctr_n[i]):
            pidx[i, pos] = (j, j); pf[i, pos] = cnf[off_cn + j]; pos += 1
        for j in range(ctr_e[i]):
            pidx[i, pos] = (ctr_ei[0, off_ce + j], ctr_ei[1, off_ce + j])
            pf[i, pos] = cef[off_ce + j]; pos += 1
        sep_pos[i, 0] = pos; pos += 1
        for j in range(ncp_n[i]):
            pidx[i, pos] = (j, j); pf[i, pos] = nnf[off_nn + j]; pos += 1
        for j in range(ncp_e[i]):
            pidx[i, pos] = (ncp_ei[0, off_ne + j], ncp_ei[1, off_ne + j])
            pf[i, pos] = nef[off_ne + j]; pos += 1
        sep_pos[i, 1] = pos                                   # == seq_len + 1
        pmask[i, :] = np.arange(max_len) >= seq_len[i]
        off_cn += ctr_n[i]; off_ce += ctr_e[i]; off_nn += ncp_n[i]; off_ne += ncp_e[i]

    order = np.where(pmask, 0, np.where(pidx[..., 0] == pidx[..., 1], 2, 1))
    pf = pf + ow[order]
    for i in range(b):                                        # SEP overwrite
        pf[i, sep_pos[i, 0]] = sw[0]
        pf[i, sep_pos[i, 1]] = sw[0]
    cls = np.broadcast_to(gw.reshape(1, 1, HIDDEN), (b, 1, HIDDEN))
    feat = np.concatenate([cls, pf], axis=1)
    mask = np.concatenate([np.zeros((b, 1), bool), pmask], axis=1)
    feat = np.where(mask[..., None], 0.0, feat).astype(np.float32)
    return feat, mask, pidx


def _bf16_round(x):
    """Round a float array through bf16 (what the kernel sees) back to f32."""
    return np.asarray(jnp.asarray(np.asarray(x, np.float32),
                                  jnp.bfloat16).astype(jnp.float32))


# ----------------------------- main -----------------------------

if __name__ == "__main__":
    key = jax.random.PRNGKey(0)
    ks = jax.random.split(key, 10)
    std = 0.2 / math.sqrt(N_LAYERS)
    params = {
        'node_w': jax.random.normal(ks[0], (4, HIDDEN), jnp.float32) * std,
        'node_b': jnp.zeros((HIDDEN,), jnp.float32),
        'edge_w': jax.random.normal(ks[1], (4, HIDDEN), jnp.float32) * std,
        'edge_b': jnp.zeros((HIDDEN,), jnp.float32),
        'graph_w': jax.random.normal(ks[2], (1, HIDDEN), jnp.float32),
        'sep_w': jax.random.normal(ks[3], (1, HIDDEN), jnp.float32),
        'order_w': jax.random.normal(ks[4], (3, HIDDEN), jnp.float32),
    }

    # synthetic batch: 2 graphs (center / ncp pairs)
    ctr_node_num = [3, 2]
    ncp_node_num = [2, 3]
    ctr_edge_num = [2, 1]
    ncp_edge_num = [1, 2]
    ctr_node_data = jax.random.normal(ks[5], (sum(ctr_node_num), 4), jnp.float32)
    ncp_node_data = jax.random.normal(ks[6], (sum(ncp_node_num), 4), jnp.float32)
    ctr_edge_data = jax.random.normal(ks[7], (sum(ctr_edge_num), 4), jnp.float32)
    ncp_edge_data = jax.random.normal(ks[8], (sum(ncp_edge_num), 4), jnp.float32)
    # batch0 edge columns first, then batch1 (second ctr edge is a self-loop)
    ctr_edge_index = np.array([[0, 1, 0], [1, 1, 1]], dtype=np.int32)   # [2, 3]
    ncp_edge_index = np.array([[0, 0, 2], [1, 1, 0]], dtype=np.int32)   # [2, 3]

    batched_data = {
        'node_data': (ctr_node_data, ncp_node_data),
        'node_num': (ctr_node_num, ncp_node_num),
        'edge_index': (ctr_edge_index, ncp_edge_index),
        'edge_data': (ctr_edge_data, ncp_edge_data),
        'edge_num': (ctr_edge_num, ncp_edge_num),
    }

    feat, pad_mask, padded_index = pretrain_embedding_forward(batched_data, params)
    jax.block_until_ready(feat)

    # Reference with bf16-rounded params/data (apples-to-apples with the bf16
    # kernel operands); remaining diff is only the final bf16 output rounding.
    params_ref = {k: _bf16_round(v) for k, v in params.items()}
    batched_data_ref = dict(batched_data)
    batched_data_ref['node_data'] = (_bf16_round(ctr_node_data), _bf16_round(ncp_node_data))
    batched_data_ref['edge_data'] = (_bf16_round(ctr_edge_data), _bf16_round(ncp_edge_data))
    ref_feat, ref_mask, ref_pidx = reference_forward(batched_data_ref, params_ref)

    np.testing.assert_allclose(np.asarray(feat.astype(jnp.float32)), ref_feat,
                               atol=1e-2, rtol=1e-2)
    assert np.array_equal(np.asarray(pad_mask), ref_mask)
    assert np.array_equal(np.asarray(padded_index), ref_pidx)
    assert feat.shape == (2, 1 + ref_pidx.shape[1], HIDDEN)
    print("KERNEL_OK")
</pallas_src>

<mosaic_0001>
module attributes {stable_mosaic.version = 11 : i64} {
  func.func @_fused_embed_kernel(%arg0: i32, %arg1: memref<16x128xbf16, #tpu.memory_space<vmem>>, %arg2: memref<128x256xbf16, #tpu.memory_space<vmem>>, %arg3: memref<16x256xbf16, #tpu.memory_space<vmem>>) attributes {dimension_semantics = [#tpu.dimension_semantics<parallel>], iteration_bounds = array<i64: 1>, scalar_prefetch = 0 : i64, scratch_operands = 0 : i64, tpu.core_type = #tpu.core_type<tc>, window_params = [{transform_indices = @transform_0, window_bounds = array<i64: 16, 128>}, {pipeline_mode = #tpu.pipeline_mode<synchronous>, transform_indices = @transform_1, window_bounds = array<i64: 128, 256>}, {transform_indices = @transform_2, window_bounds = array<i64: 16, 256>}]} {
    %c0 = arith.constant 0 : index
    %c0_0 = arith.constant 0 : index
    %0 = vector.load %arg1[%c0, %c0_0] : memref<16x128xbf16, #tpu.memory_space<vmem>>, vector<16x128xbf16>
    %c0_1 = arith.constant 0 : index
    %c0_2 = arith.constant 0 : index
    %1 = vector.load %arg2[%c0_1, %c0_2] : memref<128x256xbf16, #tpu.memory_space<vmem>>, vector<128x256xbf16>
    %cst = arith.constant dense<0.000000e+00> : vector<16x256xf32>
    %2 = tpu.matmul %0, %1, %cst {dimension_numbers = #tpu.dot_dimension_numbers<[1], [0], [0], [1], [0, 0, 1, 1], [], []>} : vector<16x128xbf16>, vector<128x256xbf16>, vector<16x256xf32> -> vector<16x256xf32>
    %3 = arith.truncf %2 : vector<16x256xf32> to vector<16x256xbf16>
    %c0_3 = arith.constant 0 : index
    %c0_4 = arith.constant 0 : index
    %4 = vector.load %arg3[%c0_3, %c0_4] : memref<16x256xbf16, #tpu.memory_space<vmem>>, vector<16x256xbf16>
    tpu.vector_store %arg3[%c0_3, %c0_4], %3 {strides = array<i32>} : memref<16x256xbf16, #tpu.memory_space<vmem>>, vector<16x256xbf16>,
    return
  }
  func.func @transform_0(%arg0: i32) -> (i32, i32) {
    %c0_i32 = arith.constant 0 : i32
    %c0_i32_0 = arith.constant 0 : i32
    return %arg0, %c0_i32 : i32, i32
  }
  func.func @transform_1(%arg0: i32) -> (i32, i32) {
    %c0_i32 = arith.constant 0 : i32
    %c0_i32_0 = arith.constant 0 : i32
    %c0_i32_1 = arith.constant 0 : i32
    return %c0_i32, %c0_i32_0 : i32, i32
  }
  func.func @transform_2(%arg0: i32) -> (i32, i32) {
    %c0_i32 = arith.constant 0 : i32
    %c0_i32_0 = arith.constant 0 : i32
    return %arg0, %c0_i32 : i32, i32
  }
}

</mosaic_0001>

<bundles_post_ra>
// kernel: tpu_custom_call.1
= control target key start
LH: loop header
LB: loop body
LE: loop exit
PB: predicated region body
PF: predicated region fallthrough
CT: control target
= control target key end

     0   :  { %7 = vsyncpa [#allocation3], 0  ;;  %s411_s0 = inlined_call_operand.hbm [shape: bf16[16,128], index: 0, kind: input, shape index: {}]   ;;  %s412_s1 = inlined_call_operand.hbm [shape: bf16[128,256], index: 1, kind: input, shape index: {}]   ;;  %s413_s2 = inlined_call_operand.hbm [shape: bf16[16,256], index: 2, kind: output, shape index: {}]  }
   0x1   :  { %8 = vsyncpa [#allocation6], 0 }
   0x2   :  { %9 = vsyncpa [#allocation4], 0  ;;  %s346_s9 = smov [#allocation2]   ;;  %s274_s13 = scalar_lea.hbm %s411_s0, 128 }
   0x3   :  { %s15_s10 = sshll.u32 %s346_s9, 4  ;;  %p275_p0 = scmp.ne.s32.totalorder %s411_s0, %s274_s13  ;;  %s16_s10 = int_to_ptr.vmem [resolvable:$true] %s15_s10 }
   0x4   :  { %p278_p1 = scmp.lt.u32.totalorder %s274_s13, %s411_s0 }
   0x6   :  { %p280_p2 = pnand %p278_p1, %p275_p0 }
   0x8   :  { %283 = shalt.err (!%p280_p2)
}
   0x9   :  { %s284_s18 = scalar_lea.vmem %s16_s10, 128  ;;  %p289_p4 = scmp.lt.s32.totalorder %s16_s10, %s16_s10 }
   0xa   :  { %p285_p3 = scmp.ne.s32.totalorder %s16_s10, %s284_s18  ;;  %p290_p5 = scmp.lt.s32.totalorder %s284_s18, %s284_s18 }
   0xc   :  { %p291_p6 = por %p290_p5, %p289_p4 }
   0xe   :  { %p292_p7 = pnand %p291_p6, %p285_p3 }
  0x10   :  { %295 = shalt.err (!%p292_p7)
}
  0x11   :  { %s347_s19 = smov 64   ;;  %s348_s20 = smov 4  }
  0x12   :  { %21 = dma.hbm_to_vmem [thread:$0]  %s411_s0, 128, %s16_s10, [#allocation3], %s347_s19, %s347_s19, %s348_s20  }
  0x13   :  { %s349_s23 = smov [#allocation5]   ;;  %s296_s27 = scalar_lea.hbm %s412_s1, 2048 }
  0x14   :  { %s27_s24 = sshll.u32 %s349_s23, 4  ;;  %p297_p8 = scmp.ne.s32.totalorder %s412_s1, %s296_s27  ;;  %s28_s24 = int_to_ptr.vmem [resolvable:$true] %s27_s24 }
  0x15   :  { %p300_p9 = scmp.lt.u32.totalorder %s296_s27, %s412_s1 }
  0x17   :  { %p302_p10 = pnand %p300_p9, %p297_p8 }
  0x19   :  { %305 = shalt.err (!%p302_p10)
}
  0x1a   :  { %s306_s4 = scalar_lea.vmem %s28_s24, 2048  ;;  %p311_p12 = scmp.lt.s32.totalorder %s28_s24, %s28_s24 }
  0x1b   :  { %p307_p11 = scmp.ne.s32.totalorder %s28_s24, %s306_s4  ;;  %p312_p13 = scmp.lt.s32.totalorder %s306_s4, %s306_s4 }
  0x1d   :  { %p313_p0 = por %p312_p13, %p311_p12 }
  0x1f   :  { %p314_p1 = pnand %p313_p0, %p307_p11 }
  0x21   :  { %317 = shalt.err (!%p314_p1)
}
  0x22   :  { %s350_s0 = smov 128   ;;  %s351_s5 = smov 8  }
  0x23   :  { %33 = dma.hbm_to_vmem [thread:$0]  %s412_s1, 2048, %s28_s24, [#allocation6], %s350_s0, %s350_s0, %s351_s5  }
  0x24   :  { %340 = dma.done.wait [#allocation3], 128  }
  0x25   :  { %341 = vsyncadd [#allocation3], 4294967168 }
  0x26   :  { %342 = dma.done.wait [#allocation6], 2048  }
  0x27   :  { %343 = vsyncadd [#allocation6], 4294965248  ;;  %v352_v0 = vmov 0   ;;  %v249_v1 = vld [vmem:[#allocation5 + $0x4] ss:$8 sps:$4 sm:$0xff]   ;;  %v273_v17 = vld [vmem:[#allocation2] sm:$0xff]  }
  0x28   :  { %177 = vmatprep.mubr.bf16.mxu0 %v352_v0  ;;  %v251_v2 = vld [vmem:[#allocation5] ss:$8 sps:$4 sm:$0xff]   ;;  %145 = vmatprep.subr.bf16.mxu0 %v249_v1  ;;  %v252_v3 = vld [vmem:[#allocation5 + $0x14] ss:$8 sps:$4 sm:$0xff]   ;;  %v254_v4 = vld [vmem:[#allocation5 + $0x10] ss:$8 sps:$4 sm:$0xff]  }
  0x29   :  { %146 = vmatpush1.bf16.msra.mxu0 %v251_v2  ;;  %v255_v5 = vld [vmem:[#allocation5 + $0x24] ss:$8 sps:$4 sm:$0xff]   ;;  %v257_v6 = vld [vmem:[#allocation5 + $0x20] ss:$8 sps:$4 sm:$0xff]   ;;  %v258_v7 = vld [vmem:[#allocation5 + $0x34] ss:$8 sps:$4 sm:$0xff]  }
  0x2a   :  { %147 = vmatprep.subr.bf16.mxu0 %v252_v3  ;;  %v260_v8 = vld [vmem:[#allocation5 + $0x30] ss:$8 sps:$4 sm:$0xff]   ;;  %v261_v9 = vld [vmem:[#allocation5 + $0x44] ss:$8 sps:$4 sm:$0xff]   ;;  %v263_v10 = vld [vmem:[#allocation5 + $0x40] ss:$8 sps:$4 sm:$0xff]  }
  0x2b   :  { %v264_v11 = vld [vmem:[#allocation5 + $0x54] ss:$8 sps:$4 sm:$0xff]   ;;  %v266_v12 = vld [vmem:[#allocation5 + $0x50] ss:$8 sps:$4 sm:$0xff]   ;;  %v267_v13 = vld [vmem:[#allocation5 + $0x64] ss:$8 sps:$4 sm:$0xff]  }
  0x2c   :  { %v269_v14 = vld [vmem:[#allocation5 + $0x60] ss:$8 sps:$4 sm:$0xff]   ;;  %v270_v15 = vld [vmem:[#allocation5 + $0x74] ss:$8 sps:$4 sm:$0xff]   ;;  %v272_v16 = vld [vmem:[#allocation5 + $0x70] ss:$8 sps:$4 sm:$0xff]  }
  0x2d   :  { %148 = vmatpush1.bf16.msra.mxu0 %v254_v4  ;;  %s353_s1 = smov [#allocation7]  }
  0x2e   :  { %149 = vmatprep.subr.bf16.mxu0 %v255_v5  ;;  %s207_s8 = sshll.u32 %s353_s1, 4  ;;  %s208_s8 = int_to_ptr.vmem [resolvable:$true] %s207_s8 }
  0x2f   :  { %s318_s9 = scalar_lea.vmem %s208_s8, 256  ;;  %p323_p3 = scmp.lt.s32.totalorder %s208_s8, %s208_s8 }
  0x30   :  { %p319_p2 = scmp.ne.s32.totalorder %s208_s8, %s318_s9  ;;  %p324_p4 = scmp.lt.s32.totalorder %s318_s9, %s318_s9 }
  0x31   :  { %150 = vmatpush1.bf16.msra.mxu0 %v257_v6 }
  0x32   :  { %151 = vmatprep.subr.bf16.mxu0 %v258_v7  ;;  %p325_p5 = por %p324_p4, %p323_p3 }
  0x34   :  { %p326_p6 = pnand %p325_p5, %p319_p2 }
  0x35   :  { %152 = vmatpush1.bf16.msra.mxu0 %v260_v8 }
  0x36   :  { %153 = vmatprep.subr.bf16.mxu0 %v261_v9 }
  0x39   :  { %154 = vmatpush1.bf16.msra.mxu0 %v263_v10 }
  0x3a   :  { %155 = vmatprep.subr.bf16.mxu0 %v264_v11 }
  0x3d   :  { %156 = vmatpush1.bf16.msra.mxu0 %v266_v12 }
  0x3e   :  { %157 = vmatprep.subr.bf16.mxu0 %v267_v13 }
  0x41   :  { %158 = vmatpush1.bf16.msra.mxu0 %v269_v14 }
  0x42   :  { %159 = vmatprep.subr.bf16.mxu0 %v270_v15 }
  0x45   :  { %160 = vmatpush1.bf16.msra.mxu0 %v272_v16 }
  0x48   :  { %178 = vmatmul.mubr.bf16.vlgmr.msra.gmra.mrb[0].mxu0 %v273_v17 }
 0x11b   :  { %v179_v18 = vpop.f32.mrb[0].mxu0 }
 0x11c   :  { %v181_v19 = vpop.f32.mrb[1].mxu0 }
 0x11d   :  { %v239_v20 = vpack.c.bf16 %v181_v19, %v179_v18  ;;  %v183_v21 = vpop.f32.mrb[2].mxu0 }
 0x11e   :  { %v185_v22 = vpop.f32.mrb[3].mxu0 }
 0x11f   :  { %200 = vst [vmem:[#allocation7] sm:$0xff] %v239_v20  ;;  %v240_v23 = vpack.c.bf16 %v185_v22, %v183_v21 }
 0x121   :  { %201 = vst [vmem:[#allocation7 + $0x8] sm:$0xff] %v240_v23 }
 0x122   :  { %329 = shalt.err (!%p326_p6)
}
 0x123   :  { %s330_s12 = scalar_lea.hbm %s413_s2, 256 }
 0x124   :  { %p331_p7 = scmp.ne.s32.totalorder %s413_s2, %s330_s12  ;;  %p334_p8 = scmp.lt.u32.totalorder %s330_s12, %s413_s2 }
 0x126   :  { %p336_p9 = pnand %p334_p8, %p331_p7 }
 0x128   :  { %339 = shalt.err (!%p336_p9)
}
 0x129   :  { %213 = dma.vmem_to_hbm [thread:$0]  %s208_s8, 256, %s413_s2, [#allocation4], %s350_s0, %s350_s0, %s351_s5  }
 0x12a   :  { %344 = dma.done.wait [#allocation4], 256  }
 0x12b   :  { %345 = vsyncadd [#allocation4], 4294967040 }
 0x12c   :  { %217 = vsyncpa [#allocation3], 1 }
 0x12d   :  { %218 = vsyncpa [#allocation6], 1 }
 0x12e   :  { %219 = vsyncpa [#allocation4], 1 }

</bundles_post_ra>
